<compile_context>
chip_gen: v7x
topology: tpu7x:2x2x1
jax: 0.10.0
libtpu: 0.0.40
codegen_flags: <defaults>
</compile_context>

<pallas_src>
import jax
import jax.numpy as jnp
from jax.experimental import pallas as pl
from jax.experimental.pallas import tpu as pltpu

EPS = 1e-5
NEG_SLOPE = 0.2


def project_kernel(x_ref, w1_ref, w2_ref, w3_ref, o_ref):
    """Whole projector fused in one kernel (small shapes, single grid cell)."""

    def batchnorm(h):
        # training-mode BatchNorm1d, single-sweep stats:
        #   mean = E[h], var = E[h^2] - E[h]^2 (biased), gamma=1, beta=0
        inv_n = 1.0 / h.shape[0]
        mean = jnp.sum(h, axis=0, keepdims=True) * inv_n
        mean_sq = jnp.sum(h * h, axis=0, keepdims=True) * inv_n
        var = jnp.maximum(mean_sq - mean * mean, 0.0)  # guard rounding
        return (h - mean) * jax.lax.rsqrt(var + EPS)

    def leaky_relu(h):
        # valid because NEG_SLOPE < 1: max(h, 0.2*h) == leaky_relu(h, 0.2)
        return jnp.maximum(h, NEG_SLOPE * h)

    # Activations stay f32; bf16 weights are promoted at the dot (cheap,
    # and avoids numerics drift vs the f32 PyTorch reference).
    x = x_ref[...]

    # Linear(d0 -> d1p, bias=False) + BN + LeakyReLU(0.2)
    h = jnp.dot(x, w1_ref[...], preferred_element_type=jnp.float32)
    h = leaky_relu(batchnorm(h))

    # Linear(d1p -> d2, bias=False) + BN + LeakyReLU(0.2)
    h = jnp.dot(h, w2_ref[...], preferred_element_type=jnp.float32)
    h = leaky_relu(batchnorm(h))

    # Linear(d2 -> d2, bias=False) + BN(affine=False)
    h = jnp.dot(h, w3_ref[...], preferred_element_type=jnp.float32)
    o_ref[...] = batchnorm(h).astype(o_ref.dtype)


def prepare_params(w1, w2, w3):
    """One-time parameter setup (hoisted out of the per-call hot path).

    Pads the hidden width d1 to a lane-dense multiple of 128 and casts the
    weights to bf16. Exactly preserved: zero columns of w1 produce zero
    features, BN maps them to exact 0 (0 * rsqrt(0 + eps)), LeakyReLU keeps 0,
    and the matching zero rows of padded w2 remove any influence on the output.
    """
    d1 = w1.shape[1]
    d1p = max(128, ((d1 + 127) // 128) * 128)
    if d1p != d1:
        w1 = jnp.pad(w1, ((0, 0), (0, d1p - d1)))
        w2 = jnp.pad(w2, ((0, d1p - d1), (0, 0)))
    return (w1.astype(jnp.bfloat16),
            w2.astype(jnp.bfloat16),
            w3.astype(jnp.bfloat16))


def project_forward(x, w1, w2, w3):
    """Forward pass. Expects weights already run through prepare_params."""
    n, d0 = x.shape
    d1p = w1.shape[1]
    d2 = w3.shape[1]

    flops = 2 * n * (d0 * d1p + d1p * d2 + d2 * d2)
    transcendentals = d1p + 2 * d2  # one rsqrt per feature per BN
    bytes_accessed = (x.size * 4 + w1.size * 2 + w2.size * 2 + w3.size * 2
                      + n * d2 * 4)

    vmem_spec = pl.BlockSpec(memory_space=pltpu.MemorySpace.VMEM)

    return pl.pallas_call(
        project_kernel,
        out_shape=jax.ShapeDtypeStruct((n, d2), jnp.float32),
        in_specs=[vmem_spec, vmem_spec, vmem_spec, vmem_spec],
        out_specs=vmem_spec,
        cost_estimate=pl.CostEstimate(
            flops=flops,
            transcendentals=transcendentals,
            bytes_accessed=bytes_accessed,
        ),
    )(x, w1, w2, w3)


# TODO(synk): for batch >> 8 on v7x, add a leading batch grid axis with
# dimension_semantics=("parallel",) to shard across the two TensorCores,
# using a two-pass (partial-stats) BatchNorm combine, and re-derive the
# batch tile against v7x's smaller (64 MiB) VMEM.


def xavier_normal(key, fan_in, fan_out):
    # torch.nn.init.xavier_normal_: std = sqrt(2 / (fan_in + fan_out))
    std = (2.0 / (fan_in + fan_out)) ** 0.5
    # stored as (in, out); kernel computes x @ W
    return std * jax.random.normal(key, (fan_in, fan_out), dtype=jnp.float32)


if __name__ == "__main__":
    # layers_dim = [d0, d1, d2]
    layers_dim = (32, 64, 128)
    batch = 8

    key = jax.random.PRNGKey(0)
    kx, k1, k2, k3 = jax.random.split(key, 4)

    x = jax.random.normal(kx, (batch, layers_dim[0]), dtype=jnp.float32)
    w1 = xavier_normal(k1, layers_dim[0], layers_dim[1])
    w2 = xavier_normal(k2, layers_dim[1], layers_dim[2])
    w3 = xavier_normal(k3, layers_dim[2], layers_dim[2])

    # One-time parameter setup (pad + bf16 cast), outside the hot path.
    w1p, w2p, w3p = prepare_params(w1, w2, w3)
    w1p, w2p, w3p = jax.block_until_ready((w1p, w2p, w3p))

    # Jit the forward so dispatch collapses to a single executable.
    forward = jax.jit(project_forward)

    z = forward(x, w1p, w2p, w3p)
    jax.block_until_ready(z)

    assert z.shape == (batch, layers_dim[2]), z.shape
    assert jnp.all(jnp.isfinite(z))
    print("KERNEL_OK")
</pallas_src>

<mosaic_0001>
module attributes {stable_mosaic.version = 11 : i64} {
  func.func @project_kernel(%arg0: memref<8x32xf32, #tpu.memory_space<vmem>>, %arg1: memref<32x128xbf16, #tpu.memory_space<vmem>>, %arg2: memref<128x128xbf16, #tpu.memory_space<vmem>>, %arg3: memref<128x128xbf16, #tpu.memory_space<vmem>>, %arg4: memref<8x128xf32, #tpu.memory_space<vmem>>) attributes {dimension_semantics = [], scalar_prefetch = 0 : i64, scratch_operands = 0 : i64, tpu.core_type = #tpu.core_type<tc>} {
    %c0 = arith.constant 0 : index
    %c0_0 = arith.constant 0 : index
    %0 = vector.load %arg0[%c0, %c0_0] : memref<8x32xf32, #tpu.memory_space<vmem>>, vector<8x32xf32>
    %c0_1 = arith.constant 0 : index
    %c0_2 = arith.constant 0 : index
    %1 = vector.load %arg1[%c0_1, %c0_2] : memref<32x128xbf16, #tpu.memory_space<vmem>>, vector<32x128xbf16>
    %cst = arith.constant dense<0.000000e+00> : vector<8x128xf32>
    %2 = tpu.matmul %0, %1, %cst {dimension_numbers = #tpu.dot_dimension_numbers<[1], [0], [0], [1], [0, 0, 1, 1], [], []>} : vector<8x32xf32>, vector<32x128xbf16>, vector<8x128xf32> -> vector<8x128xf32>
    %cst_3 = arith.constant dense<0.000000e+00> : vector<128xf32>
    %3 = vector.multi_reduction <add>, %2, %cst_3 [0] : vector<8x128xf32> to vector<128xf32>
    %4 = vector.shape_cast %3 : vector<128xf32> to vector<1x128xf32>
    %cst_4 = arith.constant 1.250000e-01 : f32
    %5 = vector.broadcast %cst_4 : f32 to vector<1x128xf32>
    %6 = arith.mulf %4, %5 : vector<1x128xf32>
    %7 = arith.mulf %2, %2 : vector<8x128xf32>
    %cst_5 = arith.constant dense<0.000000e+00> : vector<128xf32>
    %8 = vector.multi_reduction <add>, %7, %cst_5 [0] : vector<8x128xf32> to vector<128xf32>
    %9 = vector.shape_cast %8 : vector<128xf32> to vector<1x128xf32>
    %cst_6 = arith.constant 1.250000e-01 : f32
    %10 = vector.broadcast %cst_6 : f32 to vector<1x128xf32>
    %11 = arith.mulf %9, %10 : vector<1x128xf32>
    %12 = arith.mulf %6, %6 : vector<1x128xf32>
    %13 = arith.subf %11, %12 : vector<1x128xf32>
    %cst_7 = arith.constant 0.000000e+00 : f32
    %14 = vector.broadcast %cst_7 : f32 to vector<1x128xf32>
    %15 = arith.maximumf %13, %14 : vector<1x128xf32>
    %16 = vector.broadcast %6 : vector<1x128xf32> to vector<8x128xf32>
    %17 = arith.subf %2, %16 : vector<8x128xf32>
    %cst_8 = arith.constant 9.99999974E-6 : f32
    %18 = vector.broadcast %cst_8 : f32 to vector<1x128xf32>
    %19 = arith.addf %15, %18 : vector<1x128xf32>
    %20 = math.rsqrt %19 : vector<1x128xf32>
    %21 = vector.broadcast %20 : vector<1x128xf32> to vector<8x128xf32>
    %22 = arith.mulf %17, %21 : vector<8x128xf32>
    %cst_9 = arith.constant 2.000000e-01 : f32
    %23 = vector.broadcast %cst_9 : f32 to vector<8x128xf32>
    %24 = arith.mulf %23, %22 : vector<8x128xf32>
    %25 = arith.maximumf %22, %24 : vector<8x128xf32>
    %c0_10 = arith.constant 0 : index
    %c0_11 = arith.constant 0 : index
    %26 = vector.load %arg2[%c0_10, %c0_11] : memref<128x128xbf16, #tpu.memory_space<vmem>>, vector<128x128xbf16>
    %cst_12 = arith.constant dense<0.000000e+00> : vector<8x128xf32>
    %27 = tpu.matmul %25, %26, %cst_12 {dimension_numbers = #tpu.dot_dimension_numbers<[1], [0], [0], [1], [0, 0, 1, 1], [], []>} : vector<8x128xf32>, vector<128x128xbf16>, vector<8x128xf32> -> vector<8x128xf32>
    %cst_13 = arith.constant dense<0.000000e+00> : vector<128xf32>
    %28 = vector.multi_reduction <add>, %27, %cst_13 [0] : vector<8x128xf32> to vector<128xf32>
    %29 = vector.shape_cast %28 : vector<128xf32> to vector<1x128xf32>
    %cst_14 = arith.constant 1.250000e-01 : f32
    %30 = vector.broadcast %cst_14 : f32 to vector<1x128xf32>
    %31 = arith.mulf %29, %30 : vector<1x128xf32>
    %32 = arith.mulf %27, %27 : vector<8x128xf32>
    %cst_15 = arith.constant dense<0.000000e+00> : vector<128xf32>
    %33 = vector.multi_reduction <add>, %32, %cst_15 [0] : vector<8x128xf32> to vector<128xf32>
    %34 = vector.shape_cast %33 : vector<128xf32> to vector<1x128xf32>
    %cst_16 = arith.constant 1.250000e-01 : f32
    %35 = vector.broadcast %cst_16 : f32 to vector<1x128xf32>
    %36 = arith.mulf %34, %35 : vector<1x128xf32>
    %37 = arith.mulf %31, %31 : vector<1x128xf32>
    %38 = arith.subf %36, %37 : vector<1x128xf32>
    %cst_17 = arith.constant 0.000000e+00 : f32
    %39 = vector.broadcast %cst_17 : f32 to vector<1x128xf32>
    %40 = arith.maximumf %38, %39 : vector<1x128xf32>
    %41 = vector.broadcast %31 : vector<1x128xf32> to vector<8x128xf32>
    %42 = arith.subf %27, %41 : vector<8x128xf32>
    %cst_18 = arith.constant 9.99999974E-6 : f32
    %43 = vector.broadcast %cst_18 : f32 to vector<1x128xf32>
    %44 = arith.addf %40, %43 : vector<1x128xf32>
    %45 = math.rsqrt %44 : vector<1x128xf32>
    %46 = vector.broadcast %45 : vector<1x128xf32> to vector<8x128xf32>
    %47 = arith.mulf %42, %46 : vector<8x128xf32>
    %cst_19 = arith.constant 2.000000e-01 : f32
    %48 = vector.broadcast %cst_19 : f32 to vector<8x128xf32>
    %49 = arith.mulf %48, %47 : vector<8x128xf32>
    %50 = arith.maximumf %47, %49 : vector<8x128xf32>
    %c0_20 = arith.constant 0 : index
    %c0_21 = arith.constant 0 : index
    %51 = vector.load %arg3[%c0_20, %c0_21] : memref<128x128xbf16, #tpu.memory_space<vmem>>, vector<128x128xbf16>
    %cst_22 = arith.constant dense<0.000000e+00> : vector<8x128xf32>
    %52 = tpu.matmul %50, %51, %cst_22 {dimension_numbers = #tpu.dot_dimension_numbers<[1], [0], [0], [1], [0, 0, 1, 1], [], []>} : vector<8x128xf32>, vector<128x128xbf16>, vector<8x128xf32> -> vector<8x128xf32>
    %cst_23 = arith.constant dense<0.000000e+00> : vector<128xf32>
    %53 = vector.multi_reduction <add>, %52, %cst_23 [0] : vector<8x128xf32> to vector<128xf32>
    %54 = vector.shape_cast %53 : vector<128xf32> to vector<1x128xf32>
    %cst_24 = arith.constant 1.250000e-01 : f32
    %55 = vector.broadcast %cst_24 : f32 to vector<1x128xf32>
    %56 = arith.mulf %54, %55 : vector<1x128xf32>
    %57 = arith.mulf %52, %52 : vector<8x128xf32>
    %cst_25 = arith.constant dense<0.000000e+00> : vector<128xf32>
    %58 = vector.multi_reduction <add>, %57, %cst_25 [0] : vector<8x128xf32> to vector<128xf32>
    %59 = vector.shape_cast %58 : vector<128xf32> to vector<1x128xf32>
    %cst_26 = arith.constant 1.250000e-01 : f32
    %60 = vector.broadcast %cst_26 : f32 to vector<1x128xf32>
    %61 = arith.mulf %59, %60 : vector<1x128xf32>
    %62 = arith.mulf %56, %56 : vector<1x128xf32>
    %63 = arith.subf %61, %62 : vector<1x128xf32>
    %cst_27 = arith.constant 0.000000e+00 : f32
    %64 = vector.broadcast %cst_27 : f32 to vector<1x128xf32>
    %65 = arith.maximumf %63, %64 : vector<1x128xf32>
    %66 = vector.broadcast %56 : vector<1x128xf32> to vector<8x128xf32>
    %67 = arith.subf %52, %66 : vector<8x128xf32>
    %cst_28 = arith.constant 9.99999974E-6 : f32
    %68 = vector.broadcast %cst_28 : f32 to vector<1x128xf32>
    %69 = arith.addf %65, %68 : vector<1x128xf32>
    %70 = math.rsqrt %69 : vector<1x128xf32>
    %71 = vector.broadcast %70 : vector<1x128xf32> to vector<8x128xf32>
    %72 = arith.mulf %67, %71 : vector<8x128xf32>
    %c0_29 = arith.constant 0 : index
    %c0_30 = arith.constant 0 : index
    %73 = vector.load %arg4[%c0_29, %c0_30] : memref<8x128xf32, #tpu.memory_space<vmem>>, vector<8x128xf32>
    tpu.vector_store %arg4[%c0_29, %c0_30], %72 {strides = array<i32>} : memref<8x128xf32, #tpu.memory_space<vmem>>, vector<8x128xf32>,
    return
  }
}

</mosaic_0001>

<bundles_post_ra>
// kernel: project_forward.1
= control target key start
LH: loop header
LB: loop body
LE: loop exit
PB: predicated region body
PF: predicated region fallthrough
CT: control target
= control target key end

     0   :  { %9 = vsyncpa [#allocation3], 0  ;;  %s783_s0 = inlined_call_operand.hbm [shape: f32[8,32], index: 0, kind: input, shape index: {}]   ;;  %s784_s1 = inlined_call_operand.hbm [shape: bf16[32,128], index: 1, kind: input, shape index: {}]   ;;  %s785_s2 = inlined_call_operand.hbm [shape: bf16[128,128], index: 2, kind: input, shape index: {}]   ;;  %s786_s3 = inlined_call_operand.hbm [shape: bf16[128,128], index: 3, kind: input, shape index: {}]   ;;  %s787_s4 = inlined_call_operand.hbm [shape: f32[8,128], index: 4, kind: output, shape index: {}]  }
   0x1   :  { %10 = vsyncpa [#allocation6], 0 }
   0x2   :  { %11 = vsyncpa [#allocation9], 0 }
   0x3   :  { %12 = vsyncpa [#allocation4], 0  ;;  %s659_s15 = smov [#allocation5]   ;;  %s541_s19 = scalar_lea.hbm %s784_s1, 256 }
   0x4   :  { %s28_s16 = sshll.u32 %s659_s15, 4  ;;  %p542_p0 = scmp.ne.s32.totalorder %s784_s1, %s541_s19  ;;  %s29_s16 = int_to_ptr.vmem [resolvable:$true] %s28_s16 }
   0x5   :  { %p545_p1 = scmp.lt.u32.totalorder %s541_s19, %s784_s1 }
   0x7   :  { %p547_p2 = pnand %p545_p1, %p542_p0 }
   0x9   :  { %550 = shalt.err (!%p547_p2)
}
   0xa   :  { %s551_s24 = scalar_lea.vmem %s29_s16, 256  ;;  %p556_p4 = scmp.lt.s32.totalorder %s29_s16, %s29_s16 }
   0xb   :  { %p552_p3 = scmp.ne.s32.totalorder %s29_s16, %s551_s24  ;;  %p557_p5 = scmp.lt.s32.totalorder %s551_s24, %s551_s24 }
   0xd   :  { %p558_p6 = por %p557_p5, %p556_p4 }
   0xf   :  { %p559_p7 = pnand %p558_p6, %p552_p3 }
  0x11   :  { %562 = shalt.err (!%p559_p7)
}
  0x12   :  { %s660_s25 = smov 64   ;;  %s661_s26 = smov 4  }
  0x13   :  { %34 = dma.hbm_to_vmem [thread:$0]  %s784_s1, 256, %s29_s16, [#allocation6], %s660_s25, %s660_s25, %s661_s26  }
  0x14   :  { %s662_s29 = smov [#allocation2]   ;;  %s663_s5 = smov [#allocation7]  }
  0x15   :  { %s19_s30 = sshll.u32 %s662_s29, 4  ;;  %s40_s6 = sshll.u32 %s663_s5, 4  ;;  %s20_s30 = int_to_ptr.vmem [resolvable:$true] %s19_s30  ;;  %s41_s6 = int_to_ptr.vmem [resolvable:$true] %s40_s6 }
  0x16   :  { %s563_s9 = scalar_lea.hbm %s783_s0, 128 }
  0x17   :  { %p564_p8 = scmp.ne.s32.totalorder %s783_s0, %s563_s9  ;;  %p567_p9 = scmp.lt.u32.totalorder %s563_s9, %s783_s0 }
  0x19   :  { %p569_p10 = pnand %p567_p9, %p564_p8 }
  0x1b   :  { %572 = shalt.err (!%p569_p10)
}
  0x1c   :  { %s573_s1 = scalar_lea.vmem %s20_s30, 128  ;;  %p578_p12 = scmp.lt.s32.totalorder %s20_s30, %s20_s30 }
  0x1d   :  { %p574_p11 = scmp.ne.s32.totalorder %s20_s30, %s573_s1  ;;  %p579_p13 = scmp.lt.s32.totalorder %s573_s1, %s573_s1 }
  0x1f   :  { %p580_p0 = por %p579_p13, %p578_p12 }
  0x21   :  { %p581_p1 = pnand %p580_p0, %p574_p11 }
  0x23   :  { %584 = shalt.err (!%p581_p1)
}
  0x24   :  { %22 = dma.hbm_to_vmem [thread:$0]  %s783_s0, 128, %s20_s30, [#allocation3]  }
  0x25   :  { %s585_s18 = scalar_lea.hbm %s785_s2, 1024 }
  0x26   :  { %p586_p2 = scmp.ne.s32.totalorder %s785_s2, %s585_s18  ;;  %p589_p3 = scmp.lt.u32.totalorder %s585_s18, %s785_s2 }
  0x28   :  { %p591_p4 = pnand %p589_p3, %p586_p2 }
  0x2a   :  { %594 = shalt.err (!%p591_p4)
}
  0x2b   :  { %s595_s23 = scalar_lea.vmem %s41_s6, 1024  ;;  %p600_p6 = scmp.lt.s32.totalorder %s41_s6, %s41_s6 }
  0x2c   :  { %p596_p5 = scmp.ne.s32.totalorder %s41_s6, %s595_s23  ;;  %p601_p7 = scmp.lt.s32.totalorder %s595_s23, %s595_s23 }
  0x2e   :  { %p602_p8 = por %p601_p7, %p600_p6 }
  0x30   :  { %p603_p9 = pnand %p602_p8, %p596_p5 }
  0x32   :  { %606 = shalt.err (!%p603_p9)
}
  0x33   :  { %46 = dma.hbm_to_vmem [thread:$0]  %s785_s2, 1024, %s41_s6, [#allocation6], %s660_s25, %s660_s25, %s661_s26  }
  0x34   :  { %s664_s27 = smov [#allocation8]   ;;  %s607_s5 = scalar_lea.hbm %s786_s3, 1024 }
  0x35   :  { %s52_s28 = sshll.u32 %s664_s27, 4  ;;  %p608_p10 = scmp.ne.s32.totalorder %s786_s3, %s607_s5  ;;  %s53_s28 = int_to_ptr.vmem [resolvable:$true] %s52_s28 }
  0x36   :  { %p611_p11 = scmp.lt.u32.totalorder %s607_s5, %s786_s3 }
  0x38   :  { %p613_p12 = pnand %p611_p11, %p608_p10 }
  0x3a   :  { %616 = shalt.err (!%p613_p12)
}
  0x3b   :  { %s617_s11 = scalar_lea.vmem %s53_s28, 1024  ;;  %p622_p0 = scmp.lt.s32.totalorder %s53_s28, %s53_s28 }
  0x3c   :  { %p618_p13 = scmp.ne.s32.totalorder %s53_s28, %s617_s11  ;;  %p623_p1 = scmp.lt.s32.totalorder %s617_s11, %s617_s11 }
  0x3e   :  { %p624_p2 = por %p623_p1, %p622_p0 }
  0x40   :  { %p625_p3 = pnand %p624_p2, %p618_p13 }
  0x42   :  { %628 = shalt.err (!%p625_p3)
}
  0x43   :  { %58 = dma.hbm_to_vmem [thread:$0]  %s786_s3, 1024, %s53_s28, [#allocation9], %s660_s25, %s660_s25, %s661_s26  }
  0x44   :  { %651 = dma.done.wait [#allocation3], 128  }
  0x45   :  { %652 = vsyncadd [#allocation3], 4294967168 }
  0x46   :  { %653 = dma.done.wait [#allocation6], 1280  }
  0x47   :  { %654 = vsyncadd [#allocation6], 4294966016 }
  0x48   :  { %655 = dma.done.wait [#allocation9], 1024  }
  0x49   :  { %656 = vsyncadd [#allocation9], 4294966272  ;;  %v665_v0 = vmov 0.0   ;;  %vm666_vm0 = vmmov 0   ;;  %v517_v1 = vld [vmem:[#allocation5] sm:$0xff]   ;;  %v518_v2 = vld [vmem:[#allocation5 + $0x8] sm:$0xff]  }
  0x4a   :  { %463 = vmatprep.subr.bf16.mxu0 %v665_v0  ;;  %467 = vmatprep.mubr.msk.f32.mxu0 %vm666_vm0, %v665_v0  ;;  %vm89_vm1 = vcmask 261120   ;;  %v72_v3 = vld [vmem:[#allocation2] sm:$0xff]  ;;  %v519_v4 = vld [vmem:[#allocation7] sm:$0xff]   ;;  %v521_v6 = vld [vmem:[#allocation7 + $0x10] sm:$0xff]   ;;  %s667_s3 = smov [#allocation10]  }
  0x4b   :  { %470 = vmatprep.subr.bf16.mxu1 %v665_v0  ;;  %486 = vmatprep.mubr.msk.f32.mxu1 %vm666_vm0, %v665_v0  ;;  %v520_v5 = vld [vmem:[#allocation7 + $0x8] sm:$0xff]   ;;  %v522_v7 = vld [vmem:[#allocation7 + $0x18] sm:$0xff]   ;;  %v523_v8 = vld [vmem:[#allocation7 + $0x20] sm:$0xff]   ;;  %s412_s25 = sshll.u32 %s667_s3, 4  ;;  %s413_s25 = int_to_ptr.vmem [resolvable:$true] %s412_s25 }
  0x4c   :  { %464 = vmatpush3.bf16.msra.mxu0 %v517_v1  ;;  %471 = vmatpush3.bf16.msra.mxu1 %v519_v4  ;;  %v524_v9 = vld [vmem:[#allocation7 + $0x28] sm:$0xff]   ;;  %v525_v10 = vld [vmem:[#allocation7 + $0x30] sm:$0xff]   ;;  %v526_v11 = vld [vmem:[#allocation7 + $0x38] sm:$0xff]   ;;  %s629_s26 = scalar_lea.vmem %s413_s25, 128  ;;  %p634_p5 = scmp.lt.s32.totalorder %s413_s25, %s413_s25 }
  0x4d   :  { %465 = vmatprep.subr.bf16.mxu0 %v665_v0  ;;  %472 = vmatprep.subr.bf16.mxu1 %v665_v0  ;;  %v527_v38 = vld [vmem:[#allocation8] sm:$0xff]   ;;  %v528_v39 = vld [vmem:[#allocation8 + $0x8] sm:$0xff]   ;;  %v529_v40 = vld [vmem:[#allocation8 + $0x10] sm:$0xff]   ;;  %p630_p4 = scmp.ne.s32.totalorder %s413_s25, %s629_s26  ;;  %p635_p6 = scmp.lt.s32.totalorder %s629_s26, %s629_s26 }
  0x4e   :  { %v530_v41 = vld [vmem:[#allocation8 + $0x18] sm:$0xff]   ;;  %v531_v42 = vld [vmem:[#allocation8 + $0x20] sm:$0xff]   ;;  %v532_v43 = vld [vmem:[#allocation8 + $0x28] sm:$0xff]  }
  0x4f   :  { %v533_v44 = vld [vmem:[#allocation8 + $0x30] sm:$0xff]   ;;  %v534_v45 = vld [vmem:[#allocation8 + $0x38] sm:$0xff]   ;;  %p636_p7 = por %p635_p6, %p634_p5 }
  0x50   :  { %466 = vmatpush3.bf16.msra.mxu0 %v518_v2  ;;  %473 = vmatpush3.bf16.msra.mxu1 %v520_v5 }
  0x51   :  { %489 = vmatprep.subr.bf16.mxu0 %v665_v0  ;;  %474 = vmatprep.subr.bf16.mxu1 %v665_v0  ;;  %p637_p8 = pnand %p636_p7, %p630_p4 }
  0x53   :  { %468 = vmatmul.mubr.msk.f32.vlgmr.msra.gmra.mrb[0].mxu0 %vm89_vm1, %v72_v3 }
  0x54   :  { %505 = vmatprep.mubr.msk.f32.mxu0 %vm666_vm0, %v665_v0  ;;  %475 = vmatpush3.bf16.msra.mxu1 %v521_v6 }
  0x55   :  { %476 = vmatprep.subr.bf16.mxu1 %v665_v0  ;;  %490 = vmatpush3.bf16.msra.mxu0 %v527_v38 }
  0x56   :  { %491 = vmatprep.subr.bf16.mxu0 %v665_v0 }
  0x58   :  { %477 = vmatpush3.bf16.msra.mxu1 %v522_v7 }
  0x59   :  { %478 = vmatprep.subr.bf16.mxu1 %v665_v0  ;;  %492 = vmatpush3.bf16.msra.mxu0 %v528_v39 }
  0x5a   :  { %493 = vmatprep.subr.bf16.mxu0 %v665_v0 }
  0x5c   :  { %479 = vmatpush3.bf16.msra.mxu1 %v523_v8 }
  0x5d   :  { %480 = vmatprep.subr.bf16.mxu1 %v665_v0  ;;  %494 = vmatpush3.bf16.msra.mxu0 %v529_v40 }
  0x5e   :  { %495 = vmatprep.subr.bf16.mxu0 %v665_v0 }
  0x60   :  { %481 = vmatpush3.bf16.msra.mxu1 %v524_v9 }
  0x61   :  { %482 = vmatprep.subr.bf16.mxu1 %v665_v0  ;;  %496 = vmatpush3.bf16.msra.mxu0 %v530_v41 }
  0x62   :  { %497 = vmatprep.subr.bf16.mxu0 %v665_v0 }
  0x64   :  { %483 = vmatpush3.bf16.msra.mxu1 %v525_v10 }
  0x65   :  { %484 = vmatprep.subr.bf16.mxu1 %v665_v0  ;;  %498 = vmatpush3.bf16.msra.mxu0 %v531_v42 }
  0x66   :  { %499 = vmatprep.subr.bf16.mxu0 %v665_v0 }
  0x68   :  { %485 = vmatpush3.bf16.msra.mxu1 %v526_v11 }
  0x69   :  { %500 = vmatpush3.bf16.msra.mxu0 %v532_v43 }
  0x6a   :  { %501 = vmatprep.subr.bf16.mxu0 %v665_v0 }
  0x6d   :  { %502 = vmatpush3.bf16.msra.mxu0 %v533_v44 }
  0x6e   :  { %503 = vmatprep.subr.bf16.mxu0 %v665_v0 }
  0x71   :  { %504 = vmatpush3.bf16.msra.mxu0 %v534_v45 }
 0x126   :  { %v127_v12 = vpop.f32.mrb[0].mxu0 }
 0x127   :  { %v131_v13 = vrot.slane %v127_v12, 4  ;;  %v138_v14 = vmul.f32 %v127_v12, %v127_v12  ;;  %v469_v15 = vpop.f32.mrb[1].mxu0 }
 0x129   :  { %v132_v16 = vadd.f32 %v131_v13, %v127_v12  ;;  %v139_v17 = vrot.slane %v138_v14, 4 }
 0x12b   :  { %v133_v18 = vrot.slane %v132_v16, 2  ;;  %v140_v19 = vadd.f32 %v139_v17, %v138_v14 }
 0x12d   :  { %v134_v20 = vadd.f32 %v133_v18, %v132_v16  ;;  %v141_v21 = vrot.slane %v140_v19, 2 }
 0x12f   :  { %v135_v22 = vrot.slane %v134_v20, 1  ;;  %v142_v23 = vadd.f32 %v141_v21, %v140_v19 }
 0x131   :  { %v136_v24 = vadd.f32 %v135_v22, %v134_v20  ;;  %v143_v25 = vrot.slane %v142_v23, 1 }
 0x133   :  { %v137_v26 = vmul.f32 0.125, %v136_v24  ;;  %v144_v27 = vadd.f32 %v143_v25, %v142_v23 }
 0x135   :  { %v145_v28 = vmul.f32 0.125, %v144_v27  ;;  %v146_v29 = vmul.f32 %v137_v26, %v137_v26  ;;  %v149_v33 = vsub.f32 %v127_v12, %v137_v26 }
 0x137   :  { %v147_v30 = vsub.f32 %v145_v28, %v146_v29 }
 0x139   :  { %v148_v31 = vmax.f32 %v147_v30, 0.0 }
 0x13b   :  { %v150_v32 = vadd.f32 1e-05, %v148_v31 }
 0x13d   :  { %535 = vrsqrt.f32 %v150_v32 }
 0x147   :  { %v536_v34 = vpop.eup %535 }
 0x148   :  { %v152_v35 = vmul.f32 %v536_v34, %v149_v33 }
 0x14a   :  { %v153_v36 = vmul.f32 0.2, %v152_v35 }
 0x14c   :  { %v154_v37 = vmax.f32 %v152_v35, %v153_v36 }
 0x14e   :  { %487 = vmatmul.mubr.f32.vlgmr.msra.gmra.mrb[0].mxu1 %v154_v37 }
 0x221   :  { %v253_v46 = vpop.f32.mrb[0].mxu1 }
 0x222   :  { %v257_v47 = vrot.slane %v253_v46, 4  ;;  %v264_v48 = vmul.f32 %v253_v46, %v253_v46  ;;  %v488_v49 = vpop.f32.mrb[1].mxu1 }
 0x224   :  { %v258_v50 = vadd.f32 %v257_v47, %v253_v46  ;;  %v265_v51 = vrot.slane %v264_v48, 4 }
 0x226   :  { %v259_v52 = vrot.slane %v258_v50, 2  ;;  %v266_v53 = vadd.f32 %v265_v51, %v264_v48 }
 0x228   :  { %v260_v54 = vadd.f32 %v259_v52, %v258_v50  ;;  %v267_v55 = vrot.slane %v266_v53, 2 }
 0x22a   :  { %v261_v56 = vrot.slane %v260_v54, 1  ;;  %v268_v57 = vadd.f32 %v267_v55, %v266_v53 }
 0x22c   :  { %v262_v58 = vadd.f32 %v261_v56, %v260_v54  ;;  %v269_v59 = vrot.slane %v268_v57, 1 }
 0x22e   :  { %v263_v60 = vmul.f32 0.125, %v262_v58  ;;  %v270_v61 = vadd.f32 %v269_v59, %v268_v57 }
 0x230   :  { %v271_v62 = vmul.f32 0.125, %v270_v61  ;;  %v272_v63 = vmul.f32 %v263_v60, %v263_v60  ;;  %v275_v3 = vsub.f32 %v253_v46, %v263_v60 }
 0x232   :  { %v273_v0 = vsub.f32 %v271_v62, %v272_v63 }
 0x234   :  { %v274_v1 = vmax.f32 %v273_v0, 0.0 }
 0x236   :  { %v276_v2 = vadd.f32 1e-05, %v274_v1 }
 0x238   :  { %537 = vrsqrt.f32 %v276_v2 }
 0x242   :  { %v538_v4 = vpop.eup %537 }
 0x243   :  { %v278_v5 = vmul.f32 %v538_v4, %v275_v3 }
 0x245   :  { %v279_v6 = vmul.f32 0.2, %v278_v5 }
 0x247   :  { %v280_v7 = vmax.f32 %v278_v5, %v279_v6 }
 0x249   :  { %506 = vmatmul.mubr.f32.vlgmr.msra.gmra.mrb[2].mxu0 %v280_v7 }
 0x31c   :  { %v379_v8 = vpop.f32.mrb[2].mxu0 }
 0x31d   :  { %v383_v9 = vrot.slane %v379_v8, 4  ;;  %v390_v10 = vmul.f32 %v379_v8, %v379_v8  ;;  %v507_v11 = vpop.f32.mrb[3].mxu0 }
 0x31f   :  { %v384_v12 = vadd.f32 %v383_v9, %v379_v8  ;;  %v391_v13 = vrot.slane %v390_v10, 4 }
 0x321   :  { %v385_v14 = vrot.slane %v384_v12, 2  ;;  %v392_v15 = vadd.f32 %v391_v13, %v390_v10 }
 0x323   :  { %v386_v16 = vadd.f32 %v385_v14, %v384_v12  ;;  %v393_v17 = vrot.slane %v392_v15, 2 }
 0x325   :  { %v387_v18 = vrot.slane %v386_v16, 1  ;;  %v394_v19 = vadd.f32 %v393_v17, %v392_v15 }
 0x327   :  { %v395_v20 = vrot.slane %v394_v19, 1  ;;  %v388_v21 = vadd.f32 %v387_v18, %v386_v16 }
 0x329   :  { %v396_v22 = vadd.f32 %v395_v20, %v394_v19  ;;  %v389_v23 = vmul.f32 0.125, %v388_v21 }
 0x32b   :  { %v397_v24 = vmul.f32 0.125, %v396_v22  ;;  %v398_v25 = vmul.f32 %v389_v23, %v389_v23  ;;  %v401_v29 = vsub.f32 %v379_v8, %v389_v23 }
 0x32d   :  { %v399_v26 = vsub.f32 %v397_v24, %v398_v25 }
 0x32f   :  { %v400_v27 = vmax.f32 %v399_v26, 0.0 }
 0x331   :  { %v402_v28 = vadd.f32 1e-05, %v400_v27 }
 0x333   :  { %539 = vrsqrt.f32 %v402_v28 }
 0x33d   :  { %v540_v30 = vpop.eup %539 }
 0x33e   :  { %v404_v31 = vmul.f32 %v540_v30, %v401_v29 }
 0x340   :  { %405 = vst [vmem:[#allocation10] sm:$0xff] %v404_v31 }
 0x341   :  { %640 = shalt.err (!%p637_p8)
}
 0x342   :  { %s641_s1 = scalar_lea.hbm %s787_s4, 128 }
 0x343   :  { %p642_p9 = scmp.ne.s32.totalorder %s787_s4, %s641_s1  ;;  %p645_p10 = scmp.lt.u32.totalorder %s641_s1, %s787_s4 }
 0x345   :  { %p647_p11 = pnand %p645_p10, %p642_p9 }
 0x347   :  { %650 = shalt.err (!%p647_p11)
}
 0x348   :  { %415 = dma.vmem_to_hbm [thread:$0]  %s413_s25, 128, %s787_s4, [#allocation4]  }
 0x349   :  { %657 = dma.done.wait [#allocation4], 128  }
 0x34a   :  { %658 = vsyncadd [#allocation4], 4294967168 }
 0x34b   :  { %419 = vsyncpa [#allocation3], 1 }
 0x34c   :  { %420 = vsyncpa [#allocation6], 1 }
 0x34d   :  { %421 = vsyncpa [#allocation9], 1 }
 0x34e   :  { %422 = vsyncpa [#allocation4], 1 }

</bundles_post_ra>
